<compile_context>
chip_gen: v7x
topology: tpu7x:2x2x1
jax: 0.10.0
libtpu: 0.0.40
codegen_flags: <defaults>
</compile_context>

<pallas_src>
import jax
import jax.numpy as jnp
from jax.experimental import pallas as pl
from jax.experimental.pallas import tpu as pltpu


def attention_kernel(q_ref, k_ref,
                     wa_wt_ref, wa_b_ref,
                     ua_wt_ref, ua_b_ref,
                     va_w_ref, va_b_ref,
                     ctx_ref, wts_ref):
    # q_ref: (TB, H), k_ref: (TB, S, H); weights pre-transposed in the wrapper.
    q = q_ref[...]
    k = k_ref[...]
    TB, S, H = k.shape

    # Wa(query): (TB, H) @ (H, H) on the MXU, f32 accumulate.
    w = jnp.dot(q, wa_wt_ref[...],
                preferred_element_type=jnp.float32) + wa_b_ref[...]

    # Ua(keys): flattened (TB*S, H) @ (H, H) — fills the MXU M dimension.
    u = jnp.dot(k.reshape(TB * S, H), ua_wt_ref[...],
                preferred_element_type=jnp.float32) + ua_b_ref[...]
    u = u.reshape(TB, S, H)

    # tanh(Wa(q) + Ua(k)) with broadcast over the key axis.
    t = jnp.tanh(w[:, None, :] + u)                           # (TB, S, H)

    # Va(t): rank-1 product on the VPU + lane reduce (keeps the MXU free,
    # no in-kernel transpose).  scores: (TB, S), bias is an SMEM scalar.
    va_w = va_w_ref[...].astype(jnp.float32)                  # (1, H)
    scores = jnp.sum(t * va_w, axis=-1) + va_b_ref[0, 0]      # (TB, S)

    # Softmax over the key axis (numerically stable).
    m = jnp.max(scores, axis=-1, keepdims=True)
    e = jnp.exp(scores - m)
    denom = jnp.sum(e, axis=-1, keepdims=True)
    weights = e * pl.reciprocal(denom, approx=True)           # (TB, S)

    # context = weights @ keys, as VPU multiply + sublane reduce: (TB, H).
    context = jnp.sum(weights[:, :, None] * k.astype(jnp.float32), axis=1)

    ctx_ref[...] = context.astype(ctx_ref.dtype)
    wts_ref[...] = weights.astype(wts_ref.dtype)


def attention_forward(query, keys, params, *, mxu_dtype=None):
    """query: (B, 1, H), keys: (B, S, H) -> (context (B,1,H), weights (B,1,S))."""
    B, one, H = query.shape
    assert one == 1
    _, S, _ = keys.shape

    wa_w, wa_b, ua_w, ua_b, va_w, va_b = params

    # One-time host/XLA-side transposes & casts (nothing per grid step).
    cdt = jnp.float32 if mxu_dtype is None else mxu_dtype
    wa_wt = wa_w.T.astype(cdt)                     # (H, H), so q @ wa_wt = Wa(q)
    ua_wt = ua_w.T.astype(cdt)                     # (H, H)
    wa_b2 = wa_b.reshape(1, H).astype(jnp.float32)
    ua_b2 = ua_b.reshape(1, H).astype(jnp.float32)
    va_w2 = va_w.reshape(1, H).astype(jnp.float32)
    va_b2 = va_b.reshape(1, 1).astype(jnp.float32)  # SMEM scalar

    # Lane-dense 2-D I/O slabs.
    q2 = query.reshape(B, H).astype(cdt)
    k3 = keys.astype(cdt)

    # Batch TB rows per grid step so the Ua matmul sees ~256 MXU rows.
    target_rows = 256
    TB = max(1, target_rows // max(S, 1))
    if TB >= B:
        TB, Bp = B, B                              # one step covers all batches
    else:
        TB = max(8, (TB // 8) * 8)                 # clean sublane tiling
        Bp = pl.cdiv(B, TB) * TB
    if Bp != B:                                    # zero-pad batch; sliced off below
        q2 = jnp.pad(q2, ((0, Bp - B), (0, 0)))
        k3 = jnp.pad(k3, ((0, Bp - B), (0, 0), (0, 0)))

    grid_spec = pltpu.PrefetchScalarGridSpec(
        num_scalar_prefetch=0,
        grid=(Bp // TB,),
        in_specs=[
            pl.BlockSpec((TB, H), lambda b: (b, 0)),        # query (2-D)
            pl.BlockSpec((TB, S, H), lambda b: (b, 0, 0)),  # keys
            pl.BlockSpec((H, H), lambda b: (0, 0)),         # Wa.weight^T (resident)
            pl.BlockSpec((1, H), lambda b: (0, 0)),         # Wa.bias
            pl.BlockSpec((H, H), lambda b: (0, 0)),         # Ua.weight^T (resident)
            pl.BlockSpec((1, H), lambda b: (0, 0)),         # Ua.bias
            pl.BlockSpec((1, H), lambda b: (0, 0)),         # Va.weight
            pl.BlockSpec((1, 1), lambda b: (0, 0),
                         memory_space=pltpu.SMEM),          # Va.bias scalar in SMEM
        ],
        out_specs=[
            pl.BlockSpec((TB, H), lambda b: (b, 0)),        # context slab (Bp, H)
            pl.BlockSpec((TB, S), lambda b: (b, 0)),        # weights slab (Bp, S)
        ],
    )

    context2, weights2 = pl.pallas_call(
        attention_kernel,
        out_shape=(
            jax.ShapeDtypeStruct((Bp, H), jnp.float32),
            jax.ShapeDtypeStruct((Bp, S), jnp.float32),
        ),
        grid_spec=grid_spec,
        compiler_params=pltpu.CompilerParams(
            # Parallel batch axis: shards across the 2 TensorCores on v7x,
            # no-op on v5e/v6e.
            dimension_semantics=("parallel",)),
    )(q2, k3, wa_wt, wa_b2, ua_wt, ua_b2, va_w2, va_b2)

    # TODO(synk): for very large S, add a second "arbitrary" grid axis tiling S
    # with an online softmax so the keys block stays within VMEM (64 MiB on v7x).

    context = context2[:B].reshape(B, 1, H)
    weights = weights2[:B].reshape(B, 1, S)
    return context, weights


def init_params(key, hidden_size):
    """Deterministic init mirroring nn.Linear shapes: weight (out,in), bias (out,)."""
    k = jax.random.split(key, 6)
    bound = 1.0 / jnp.sqrt(hidden_size)
    wa_w = jax.random.uniform(k[0], (hidden_size, hidden_size), jnp.float32, -bound, bound)
    wa_b = jax.random.uniform(k[1], (hidden_size,), jnp.float32, -bound, bound)
    ua_w = jax.random.uniform(k[2], (hidden_size, hidden_size), jnp.float32, -bound, bound)
    ua_b = jax.random.uniform(k[3], (hidden_size,), jnp.float32, -bound, bound)
    va_w = jax.random.uniform(k[4], (1, hidden_size), jnp.float32, -bound, bound)
    va_b = jax.random.uniform(k[5], (1,), jnp.float32, -bound, bound)
    return (wa_w, wa_b, ua_w, ua_b, va_w, va_b)


def reference_forward(query, keys, params):
    """Pure-JAX reference replicating the PyTorch forward."""
    wa_w, wa_b, ua_w, ua_b, va_w, va_b = params
    w = query @ wa_w.T + wa_b              # (B, 1, H)
    u = keys @ ua_w.T + ua_b               # (B, S, H)
    v = jnp.tanh(w + u) @ va_w.T + va_b    # (B, S, 1)
    scores = v[:, :, 0][:, None, :]        # (B, 1, S)
    weights = jax.nn.softmax(scores, axis=-1)
    context = jnp.einsum("bqs,bsh->bqh", weights, keys)
    return context, weights


if __name__ == "__main__":
    B, S, H = 2, 8, 32
    key = jax.random.PRNGKey(0)
    kq, kk, kp = jax.random.split(key, 3)

    query = jax.random.normal(kq, (B, 1, H), jnp.float32)
    keys = jax.random.normal(kk, (B, S, H), jnp.float32)
    params = init_params(kp, H)

    context, weights = attention_forward(query, keys, params)
    jax.block_until_ready((context, weights))

    ref_ctx, ref_wts = reference_forward(query, keys, params)
    assert context.shape == (B, 1, H) and weights.shape == (B, 1, S)
    # Tolerance covers the EUP approximate-reciprocal used in the softmax.
    assert jnp.allclose(weights, ref_wts, atol=5e-3, rtol=5e-3)
    assert jnp.allclose(context, ref_ctx, atol=5e-3, rtol=5e-3)

    print("KERNEL_OK")
</pallas_src>

<mosaic_0001>
module attributes {stable_mosaic.version = 11 : i64} {
  func.func @attention_kernel(%arg0: i32, %arg1: memref<2x32xf32, #tpu.memory_space<vmem>>, %arg2: memref<2x8x32xf32, #tpu.memory_space<vmem>>, %arg3: memref<32x32xf32, #tpu.memory_space<vmem>>, %arg4: memref<1x32xf32, #tpu.memory_space<vmem>>, %arg5: memref<32x32xf32, #tpu.memory_space<vmem>>, %arg6: memref<1x32xf32, #tpu.memory_space<vmem>>, %arg7: memref<1x32xf32, #tpu.memory_space<vmem>>, %arg8: memref<1x1xf32, #tpu.memory_space<smem>>, %arg9: memref<2x32xf32, #tpu.memory_space<vmem>>, %arg10: memref<2x8xf32, #tpu.memory_space<vmem>>) attributes {dimension_semantics = [#tpu.dimension_semantics<parallel>], iteration_bounds = array<i64: 1>, scalar_prefetch = 0 : i64, scratch_operands = 0 : i64, tpu.core_type = #tpu.core_type<tc>, window_params = [{transform_indices = @transform_0, window_bounds = array<i64: 2, 32>}, {transform_indices = @transform_1, window_bounds = array<i64: 2, 8, 32>}, {pipeline_mode = #tpu.pipeline_mode<synchronous>, transform_indices = @transform_2, window_bounds = array<i64: 32, 32>}, {pipeline_mode = #tpu.pipeline_mode<synchronous>, transform_indices = @transform_3, window_bounds = array<i64: 1, 32>}, {pipeline_mode = #tpu.pipeline_mode<synchronous>, transform_indices = @transform_4, window_bounds = array<i64: 32, 32>}, {pipeline_mode = #tpu.pipeline_mode<synchronous>, transform_indices = @transform_5, window_bounds = array<i64: 1, 32>}, {pipeline_mode = #tpu.pipeline_mode<synchronous>, transform_indices = @transform_6, window_bounds = array<i64: 1, 32>}, {transform_indices = @transform_7, window_bounds = array<i64: 1, 1>}, {transform_indices = @transform_8, window_bounds = array<i64: 2, 32>}, {transform_indices = @transform_9, window_bounds = array<i64: 2, 8>}]} {
    %c0 = arith.constant 0 : index
    %c0_0 = arith.constant 0 : index
    %0 = vector.load %arg1[%c0, %c0_0] : memref<2x32xf32, #tpu.memory_space<vmem>>, vector<2x32xf32>
    %c0_1 = arith.constant 0 : index
    %c0_2 = arith.constant 0 : index
    %c0_3 = arith.constant 0 : index
    %1 = vector.load %arg2[%c0_1, %c0_2, %c0_3] : memref<2x8x32xf32, #tpu.memory_space<vmem>>, vector<2x8x32xf32>
    %c0_4 = arith.constant 0 : index
    %c0_5 = arith.constant 0 : index
    %2 = vector.load %arg3[%c0_4, %c0_5] : memref<32x32xf32, #tpu.memory_space<vmem>>, vector<32x32xf32>
    %cst = arith.constant dense<0.000000e+00> : vector<2x32xf32>
    %3 = tpu.matmul %0, %2, %cst {dimension_numbers = #tpu.dot_dimension_numbers<[1], [0], [0], [1], [0, 0, 1, 1], [], []>} : vector<2x32xf32>, vector<32x32xf32>, vector<2x32xf32> -> vector<2x32xf32>
    %c0_6 = arith.constant 0 : index
    %c0_7 = arith.constant 0 : index
    %4 = vector.load %arg4[%c0_6, %c0_7] : memref<1x32xf32, #tpu.memory_space<vmem>>, vector<1x32xf32>
    %5 = vector.broadcast %4 : vector<1x32xf32> to vector<2x32xf32>
    %6 = arith.addf %3, %5 : vector<2x32xf32>
    %7 = vector.shape_cast %1 : vector<2x8x32xf32> to vector<16x32xf32>
    %c0_8 = arith.constant 0 : index
    %c0_9 = arith.constant 0 : index
    %8 = vector.load %arg5[%c0_8, %c0_9] : memref<32x32xf32, #tpu.memory_space<vmem>>, vector<32x32xf32>
    %cst_10 = arith.constant dense<0.000000e+00> : vector<16x32xf32>
    %9 = tpu.matmul %7, %8, %cst_10 {dimension_numbers = #tpu.dot_dimension_numbers<[1], [0], [0], [1], [0, 0, 1, 1], [], []>} : vector<16x32xf32>, vector<32x32xf32>, vector<16x32xf32> -> vector<16x32xf32>
    %c0_11 = arith.constant 0 : index
    %c0_12 = arith.constant 0 : index
    %10 = vector.load %arg6[%c0_11, %c0_12] : memref<1x32xf32, #tpu.memory_space<vmem>>, vector<1x32xf32>
    %11 = vector.broadcast %10 : vector<1x32xf32> to vector<16x32xf32>
    %12 = arith.addf %9, %11 : vector<16x32xf32>
    %13 = vector.shape_cast %12 : vector<16x32xf32> to vector<2x8x32xf32>
    %14 = vector.shape_cast %6 : vector<2x32xf32> to vector<2x1x32xf32>
    %15 = vector.broadcast %14 : vector<2x1x32xf32> to vector<2x8x32xf32>
    %16 = arith.addf %15, %13 : vector<2x8x32xf32>
    %17 = math.tanh %16 : vector<2x8x32xf32>
    %c0_13 = arith.constant 0 : index
    %c0_14 = arith.constant 0 : index
    %18 = vector.load %arg7[%c0_13, %c0_14] : memref<1x32xf32, #tpu.memory_space<vmem>>, vector<1x32xf32>
    %19 = vector.shape_cast %18 : vector<1x32xf32> to vector<1x1x32xf32>
    %20 = vector.broadcast %19 : vector<1x1x32xf32> to vector<2x8x32xf32>
    %21 = arith.mulf %17, %20 : vector<2x8x32xf32>
    %cst_15 = arith.constant dense<0.000000e+00> : vector<2x8xf32>
    %22 = vector.multi_reduction <add>, %21, %cst_15 [2] : vector<2x8x32xf32> to vector<2x8xf32>
    %c0_16 = arith.constant 0 : index
    %c0_17 = arith.constant 0 : index
    %23 = memref.load %arg8[%c0_16, %c0_17] : memref<1x1xf32, #tpu.memory_space<smem>>
    %24 = vector.broadcast %23 : f32 to vector<2x8xf32>
    %25 = arith.addf %22, %24 : vector<2x8xf32>
    %cst_18 = arith.constant dense<0xFF800000> : vector<2xf32>
    %26 = vector.multi_reduction <maximumf>, %25, %cst_18 [1] : vector<2x8xf32> to vector<2xf32>
    %27 = vector.shape_cast %26 : vector<2xf32> to vector<2x1xf32>
    %28 = vector.broadcast %27 : vector<2x1xf32> to vector<2x8xf32>
    %29 = arith.subf %25, %28 : vector<2x8xf32>
    %30 = math.exp %29 : vector<2x8xf32>
    %cst_19 = arith.constant dense<0.000000e+00> : vector<2xf32>
    %31 = vector.multi_reduction <add>, %30, %cst_19 [1] : vector<2x8xf32> to vector<2xf32>
    %32 = vector.shape_cast %31 : vector<2xf32> to vector<2x1xf32>
    %33 = tpu.reciprocal %32 {approx = true} : vector<2x1xf32> -> vector<2x1xf32>
    %34 = vector.broadcast %33 : vector<2x1xf32> to vector<2x8xf32>
    %35 = arith.mulf %30, %34 : vector<2x8xf32>
    %36 = vector.shape_cast %35 : vector<2x8xf32> to vector<2x8x1xf32>
    %37 = vector.broadcast %36 : vector<2x8x1xf32> to vector<2x8x32xf32>
    %38 = arith.mulf %37, %1 : vector<2x8x32xf32>
    %cst_20 = arith.constant dense<0.000000e+00> : vector<2x32xf32>
    %39 = vector.multi_reduction <add>, %38, %cst_20 [1] : vector<2x8x32xf32> to vector<2x32xf32>
    %c0_21 = arith.constant 0 : index
    %c0_22 = arith.constant 0 : index
    %40 = vector.load %arg9[%c0_21, %c0_22] : memref<2x32xf32, #tpu.memory_space<vmem>>, vector<2x32xf32>
    tpu.vector_store %arg9[%c0_21, %c0_22], %39 {strides = array<i32>} : memref<2x32xf32, #tpu.memory_space<vmem>>, vector<2x32xf32>,
    %c0_23 = arith.constant 0 : index
    %c0_24 = arith.constant 0 : index
    %41 = vector.load %arg10[%c0_23, %c0_24] : memref<2x8xf32, #tpu.memory_space<vmem>>, vector<2x8xf32>
    tpu.vector_store %arg10[%c0_23, %c0_24], %35 {strides = array<i32>} : memref<2x8xf32, #tpu.memory_space<vmem>>, vector<2x8xf32>,
    return
  }
  func.func @transform_0(%arg0: i32) -> (i32, i32) {
    %c0_i32 = arith.constant 0 : i32
    %c0_i32_0 = arith.constant 0 : i32
    return %arg0, %c0_i32 : i32, i32
  }
  func.func @transform_1(%arg0: i32) -> (i32, i32, i32) {
    %c0_i32 = arith.constant 0 : i32
    %c0_i32_0 = arith.constant 0 : i32
    %c0_i32_1 = arith.constant 0 : i32
    return %arg0, %c0_i32, %c0_i32_0 : i32, i32, i32
  }
  func.func @transform_2(%arg0: i32) -> (i32, i32) {
    %c0_i32 = arith.constant 0 : i32
    %c0_i32_0 = arith.constant 0 : i32
    %c0_i32_1 = arith.constant 0 : i32
    return %c0_i32, %c0_i32_0 : i32, i32
  }
  func.func @transform_3(%arg0: i32) -> (i32, i32) {
    %c0_i32 = arith.constant 0 : i32
    %c0_i32_0 = arith.constant 0 : i32
    %c0_i32_1 = arith.constant 0 : i32
    return %c0_i32, %c0_i32_0 : i32, i32
  }
  func.func @transform_4(%arg0: i32) -> (i32, i32) {
    %c0_i32 = arith.constant 0 : i32
    %c0_i32_0 = arith.constant 0 : i32
    %c0_i32_1 = arith.constant 0 : i32
    return %c0_i32, %c0_i32_0 : i32, i32
  }
  func.func @transform_5(%arg0: i32) -> (i32, i32) {
    %c0_i32 = arith.constant 0 : i32
    %c0_i32_0 = arith.constant 0 : i32
    %c0_i32_1 = arith.constant 0 : i32
    return %c0_i32, %c0_i32_0 : i32, i32
  }
  func.func @transform_6(%arg0: i32) -> (i32, i32) {
    %c0_i32 = arith.constant 0 : i32
    %c0_i32_0 = arith.constant 0 : i32
    %c0_i32_1 = arith.constant 0 : i32
    return %c0_i32, %c0_i32_0 : i32, i32
  }
  func.func @transform_7(%arg0: i32) -> (i32, i32) {
    %c0_i32 = arith.constant 0 : i32
    %c0_i32_0 = arith.constant 0 : i32
    %c0_i32_1 = arith.constant 0 : i32
    return %c0_i32, %c0_i32_0 : i32, i32
  }
  func.func @transform_8(%arg0: i32) -> (i32, i32) {
    %c0_i32 = arith.constant 0 : i32
    %c0_i32_0 = arith.constant 0 : i32
    return %arg0, %c0_i32 : i32, i32
  }
  func.func @transform_9(%arg0: i32) -> (i32, i32) {
    %c0_i32 = arith.constant 0 : i32
    %c0_i32_0 = arith.constant 0 : i32
    return %arg0, %c0_i32 : i32, i32
  }
}

</mosaic_0001>

<bundles_post_ra>
// kernel: tpu_custom_call.1
= control target key start
LH: loop header
LB: loop body
LE: loop exit
PB: predicated region body
PF: predicated region fallthrough
CT: control target
= control target key end

     0   :  { %16 = vsyncpa [#allocation4], 0  ;;  %s837_s0 = inlined_call_operand.vmem [shape: f32[2,32], index: 0, kind: input, shape index: {}]   ;;  %s838_s1 = inlined_call_operand.hbm [shape: f32[2,8,32], index: 1, kind: input, shape index: {}]   ;;  %s839_s2 = inlined_call_operand.hbm [shape: f32[32,32], index: 2, kind: input, shape index: {}]   ;;  %s840_s3 = inlined_call_operand.vmem [shape: f32[1,32], index: 3, kind: input, shape index: {}]   ;;  %s841_s4 = inlined_call_operand.hbm [shape: f32[32,32], index: 4, kind: input, shape index: {}]   ;;  %s842_s5 = inlined_call_operand.vmem [shape: f32[1,32], index: 5, kind: input, shape index: {}]   ;;  %s843_s6 = inlined_call_operand.vmem [shape: f32[1,32], index: 6, kind: input, shape index: {}]   ;;  %s844_s7 = inlined_call_operand.<no memory space> [shape: f32[1,1], index: 7, kind: input, shape index: {}]   ;;  %s845_s8 = inlined_call_operand.hbm [shape: f32[2,32], index: 8, kind: output, shape index: {0}]   ;;  %s846_s9 = inlined_call_operand.hbm [shape: f32[2,8], index: 9, kind: output, shape index: {1}]  }
   0x1   :  { %17 = vsyncpa [#allocation7], 0 }
   0x2   :  { %18 = vsyncpa [#allocation5], 0 }
   0x3   :  { %19 = vsyncpa [#allocation11], 0  ;;  %s650_s30 = smov [#allocation6]   ;;  %s651_s11 = smov [#allocation3]  }
   0x4   :  { %s39_s10 = sshll.u32 %s650_s30, 4  ;;  %s27_s12 = sshll.u32 %s651_s11, 4  ;;  %s40_s10 = int_to_ptr.vmem [resolvable:$true] %s39_s10  ;;  %s712_s12 = int_to_ptr.vmem [resolvable:$true] %s27_s12 }
   0x5   :  { %s532_s15 = scalar_lea.hbm %s839_s2, 512 }
   0x6   :  { %p533_p0 = scmp.ne.s32.totalorder %s839_s2, %s532_s15  ;;  %p536_p1 = scmp.lt.u32.totalorder %s532_s15, %s839_s2 }
   0x8   :  { %p538_p2 = pnand %p536_p1, %p533_p0 }
   0xa   :  { %541 = shalt.err (!%p538_p2)
}
   0xb   :  { %s542_s20 = scalar_lea.vmem %s40_s10, 512  ;;  %p547_p4 = scmp.lt.s32.totalorder %s40_s10, %s40_s10 }
   0xc   :  { %p543_p3 = scmp.ne.s32.totalorder %s40_s10, %s542_s20  ;;  %p548_p5 = scmp.lt.s32.totalorder %s542_s20, %s542_s20 }
   0xe   :  { %p549_p6 = por %p548_p5, %p547_p4 }
  0x10   :  { %p550_p7 = pnand %p549_p6, %p543_p3 }
  0x12   :  { %553 = shalt.err (!%p550_p7)
}
  0x13   :  { %s652_s21 = smov 128   ;;  %s653_s22 = smov 8  }
  0x14   :  { %45 = dma.hbm_to_vmem [thread:$0]  %s839_s2, 512, %s40_s10, [#allocation7], %s652_s21, %s652_s21, %s653_s22  }
  0x15   :  { %s554_s27 = scalar_lea.hbm %s838_s1, 256 }
  0x16   :  { %p555_p8 = scmp.ne.s32.totalorder %s838_s1, %s554_s27  ;;  %p558_p9 = scmp.lt.u32.totalorder %s554_s27, %s838_s1 }
  0x18   :  { %p560_p10 = pnand %p558_p9, %p555_p8 }
  0x1a   :  { %563 = shalt.err (!%p560_p10)
}
  0x1b   :  { %s564_s13 = scalar_lea.vmem %s712_s12, 256  ;;  %p569_p12 = scmp.lt.s32.totalorder %s712_s12, %s712_s12 }
  0x1c   :  { %p565_p11 = scmp.ne.s32.totalorder %s712_s12, %s564_s13  ;;  %p570_p13 = scmp.lt.s32.totalorder %s564_s13, %s564_s13 }
  0x1e   :  { %p571_p0 = por %p570_p13, %p569_p12 }
  0x20   :  { %p572_p1 = pnand %p571_p0, %p565_p11 }
  0x22   :  { %575 = shalt.err (!%p572_p1)
}
  0x23   :  { %33 = dma.hbm_to_vmem [thread:$0]  %s838_s1, 256, %s712_s12, [#allocation4], %s652_s21, %s652_s21, %s653_s22  }
  0x24   :  { %s654_s14 = smov [#allocation8]   ;;  %s576_s18 = scalar_lea.hbm %s841_s4, 512 }
  0x25   :  { %s53_s15 = sshll.u32 %s654_s14, 4  ;;  %p577_p2 = scmp.ne.s32.totalorder %s841_s4, %s576_s18  ;;  %s54_s15 = int_to_ptr.vmem [resolvable:$true] %s53_s15 }
  0x26   :  { %p580_p3 = scmp.lt.u32.totalorder %s576_s18, %s841_s4 }
  0x28   :  { %p582_p4 = pnand %p580_p3, %p577_p2 }
  0x2a   :  { %585 = shalt.err (!%p582_p4)
}
  0x2b   :  { %s586_s25 = scalar_lea.vmem %s54_s15, 512  ;;  %p591_p6 = scmp.lt.s32.totalorder %s54_s15, %s54_s15 }
  0x2c   :  { %p587_p5 = scmp.ne.s32.totalorder %s54_s15, %s586_s25  ;;  %p592_p7 = scmp.lt.s32.totalorder %s586_s25, %s586_s25 }
  0x2e   :  { %p593_p8 = por %p592_p7, %p591_p6 }
  0x30   :  { %p594_p9 = pnand %p593_p8, %p587_p5 }
  0x32   :  { %597 = shalt.err (!%p594_p9)
}
  0x33   :  { %59 = dma.hbm_to_vmem [thread:$0]  %s841_s4, 512, %s54_s15, [#allocation7], %s652_s21, %s652_s21, %s653_s22  }
  0x34   :  { %642 = dma.done.wait [#allocation4], 256  }
  0x35   :  { %643 = vsyncadd [#allocation4], 4294967040 }
  0x36   :  { %644 = dma.done.wait [#allocation7], 1024  }
  0x37   :  { %645 = vsyncadd [#allocation7], 4294966272  ;;  %v655_v0 = vmov 0.0|0.0   ;;  %vm656_vm0 = vmmov 0   ;;  %v657_v1 = vmov 0.0   ;;  %v78_v2 = vld [vmem:[#allocation6] sm:$0xff]  ;;  %v259_v19 = vlaneseq }
  0x38   :  { %494 = vmatprep.subr.bf16.mxu0 %v655_v0  ;;  %480 = vmatprep.mubr.msk.f32.mxu0 %vm656_vm0, %v657_v1  ;;  %v79_v3 = vld [vmem:[#allocation6 + $0x8] sm:$0xff]  ;;  %v163_v4 = vld [vmem:[#allocation8] sm:$0xff]  ;;  %v80_v7 = vld [vmem:[#allocation6 + $0x10] sm:$0xff]  ;;  %vm89_vm1 = vcmask 261120   ;;  %v658_v17 = vmov 1966171168   ;;  %v308_v49 = vstv %s844_s7 }
  0x39   :  { %v495_v5 = vpack.c.bf16 %v79_v3, %v78_v2  ;;  %v164_v6 = vld [vmem:[#allocation8 + $0x8] sm:$0xff]  ;;  %v81_v8 = vld [vmem:[#allocation6 + $0x18] sm:$0xff]  ;;  %v165_v10 = vld [vmem:[#allocation8 + $0x10] sm:$0xff]  ;;  %v257_v18 = vunpack.c.l.s4 %v658_v17  ;;  %v776_v21 = vshrl.u32 %v259_v19, 7  ;;  %v314_v48 = vand.u32 127, %v259_v19 }
  0x3a   :  { %v500_v9 = vpack.c.bf16 %v164_v6, %v163_v4  ;;  %v166_v11 = vld [vmem:[#allocation8 + $0x18] sm:$0xff]  ;;  %v498_v12 = vpack.c.bf16 %v81_v8, %v80_v7  ;;  %v764_v14 = vld [vmem:[#allocation3] sm:$0xff]  ;;  %vm323_vm2 = vcmask 1041409   ;;  %vm326_vm3 = vcmask 58368  }
  0x3b   :  { %496 = vmatpush3.bf16.msra.mxu0 %v495_v5  ;;  %v504_v13 = vpack.c.bf16 %v166_v11, %v165_v10  ;;  %491 = vmatprep.mubr.msk.f32.mxu1 %vm89_vm1, %v764_v14  ;;  %v75_v15 = vld [vmem:[%s837_s0] sm:$0x3]  ;;  %v771_v16 = vld [vmem:[#allocation3 + $0x8] sm:$0xff]  ;;  %v258_v20 = vunpack.c.0.s8 %v257_v18  ;;  %v786_v30 = vsub.s32 0, %v776_v21  ;;  %v317_v51 = vsub.s32 %v314_v48, %v776_v21 }
  0x3c   :  { %497 = vmatprep.subr.bf16.mxu0 %v655_v0  ;;  %501 = vmatprep.subr.bf16.mxu1 %v500_v9  ;;  %v455_v22 = vld [vmem:[%s840_s3] ss:$0 sm:$0xff]  ;;  %v659_v59 = vmov 0   ;;  %v337_v60 = vsub.s32 1, %v776_v21 }
  0x3d   :  { %503 = vmatpush3.bf16.msra.mxu1 %v500_v9  ;;  %v261_v23 = vsub.s32 %v258_v20, %v776_v21  ;;  %v457_v28 = vld [vmem:[%s842_s5] ss:$0 sm:$0xff]  ;;  %521 = vset.pattern.permute.xlu0 %v659_v59 }
  0x3e   :  { %505 = vmatprep.subr.bf16.mxu1 %v504_v13  ;;  %v460_v41 = vld [vmem:[%s843_s6] ss:$0 sm:$0xff]  ;;  %520 = vset.pattern.permute.xlu1 %v659_v59  ;;  %s660_s6 = smov [#allocation10]  }
  0x3f   :  { %499 = vmatpush3.bf16.msra.mxu0 %v498_v12  ;;  %s441_s7 = sshll.u32 %s660_s6, 4  ;;  %s442_s7 = int_to_ptr.vmem [resolvable:$true] %s441_s7 }
  0x40   :  { %s598_s30 = scalar_lea.vmem %s442_s7, 32  ;;  %p603_p11 = scmp.lt.s32.totalorder %s442_s7, %s442_s7 }
  0x41   :  { %507 = vmatpush3.bf16.msra.mxu1 %v504_v13  ;;  %p599_p10 = scmp.ne.s32.totalorder %s442_s7, %s598_s30  ;;  %p604_p12 = scmp.lt.s32.totalorder %s598_s30, %s598_s30 }
  0x42   :  { %481 = vmatmul.mubr.msk.f32.vlgmr.msra.gmra.mrb[0].mxu0 %vm89_vm1, %v75_v15 }
  0x43   :  { %p605_p13 = por %p604_p12, %p603_p11 }
  0x44   :  { %492 = vmatmul.mubr.msk.f32.vlgmr.msra.gmra.mrb[0].mxu1 %vm89_vm1, %v771_v16 }
  0x45   :  { %p606_p0 = pnand %p605_p13, %p599_p10 }
 0x115   :  { %v159_v24 = vpop.f32.mrb[0].mxu0 }
 0x116   :  { %v160_v25 = vadd.f32 %v455_v22, %v159_v24  ;;  %v482_v26 = vpop.f32.mrb[1].mxu0 }
 0x117   :  { %v493_v27 = vpop.f32.mrb[0].mxu1 }
 0x118   :  { %v262_v29 = vrot.slane %v160_v25, %v261_v23  ;;  %v246_v31 = vpop.f32.mrb[1].mxu1  ;;  %v252_v37 = vadd.f32 %v493_v27, %v457_v28 }
 0x119   :  { %v247_v34 = vadd.f32 %v457_v28, %v246_v31 }
 0x11a   :  { %v263_v32 = vcombine.high %v262_v29, %v262_v29  ;;  %v270_v33 = vrot.slane %v262_v29, %v261_v23 }
 0x11c   :  { %v277_v35 = vrot.slane %v263_v32, %v261_v23  ;;  %v281_v36 = vrot.slane %v270_v33, %v786_v30 }
 0x11e   :  { %v285_v38 = vrot.slane %v277_v35, %v786_v30  ;;  %v288_v39 = vadd.f32 %v281_v36, %v247_v34 }
 0x120   :  { %v289_v40 = vadd.f32 %v285_v38, %v252_v37  ;;  %522 = vtanh.f32 %v288_v39 }
 0x122   :  { %524 = vtanh.f32 %v289_v40 }
 0x12a   :  { %v523_v42 = vpop.eup %522 }
 0x12b   :  { %v299_v43 = vmul.f32 %v523_v42, %v460_v41 }
 0x12c   :  { %v525_v44 = vpop.eup %524 }
 0x12d   :  { %v301_v45 = vsel %vm89_vm1, %v299_v43, 0.0  ;;  %v300_v46 = vmul.f32 %v525_v44, %v460_v41 }
 0x12e   :  { %302 = vadd.xlane.f32.xlu0 %v301_v45 }
 0x12f   :  { %v304_v47 = vsel %vm89_vm1, %v300_v46, 0.0 }
 0x132   :  { %305 = vadd.xlane.f32.xlu0 %v304_v47 }
 0x1bb   :  { %v303_v50 = vpop.xlane.xlu0 %302 }
 0x1bc   :  { %v309_v52 = vadd.f32 %v308_v49, %v303_v50 }
 0x1be   :  { %v318_v55 = vrot.slane %v309_v52, %v317_v51 }
 0x1bf   :  { %v306_v53 = vpop.xlane.xlu0 %305 }
 0x1c0   :  { %v310_v54 = vadd.f32 %v308_v49, %v306_v53 }
 0x1c2   :  { %v322_v56 = vrot.slane %v310_v54, %v317_v51 }
 0x1c4   :  { %v324_v57 = vsel %vm323_vm2, %v322_v56, %v318_v55 }
 0x1c5   :  { %v327_v58 = vsel %vm326_vm3, %v324_v57, -inf }
 0x1c6   :  { %328 = vmax.xlane.f32.xlu1 %v327_v58 }
 0x253   :  { %v329_v61 = vpop.xlane.xlu1 %328 }
 0x254   :  { %v334_v62 = vrot.slane %v329_v61, %v786_v30  ;;  %v338_v63 = vrot.slane %v329_v61, %v337_v60 }
 0x256   :  { %v341_v0 = vsub.f32 %v309_v52, %v334_v62  ;;  %v342_v1 = vsub.f32 %v310_v54, %v338_v63 }
 0x258   :  { %v343_v2 = vmul.f32 1.442695, %v341_v0  ;;  %v345_v3 = vmul.f32 1.442695, %v342_v1 }
 0x25a   :  { %526 = vpow2.f32 %v343_v2 }
 0x25b   :  { %528 = vpow2.f32 %v345_v3 }
 0x264   :  { %v527_v4 = vpop.eup %526 }
 0x265   :  { %v529_v5 = vpop.eup %528  ;;  %350 = vperm.xlu1 %520, %v527_v4  }
 0x266   :  { %353 = vperm.xlu0 %521, %v529_v5  }
 0x2e4   :  { %v351_v6 = vpop.permute.xlu1 %350 }
 0x2e5   :  { %v354_v7 = vpop.permute.xlu0 %353  ;;  %v358_v8 = vrot.slane %v351_v6, %v317_v51 }
 0x2e6   :  { %v362_v9 = vrot.slane %v354_v7, %v317_v51 }
 0x2e8   :  { %v363_v10 = vsel %vm323_vm2, %v362_v9, %v358_v8 }
 0x2e9   :  { %v365_v11 = vsel %vm326_vm3, %v363_v10, 0.0 }
 0x2ea   :  { %366 = vadd.xlane.f32.xlu1 %v365_v11 }
 0x377   :  { %v367_v12 = vpop.xlane.xlu1 %366 }
 0x378   :  { %530 = vrcp.f32 %v367_v12 }
 0x382   :  { %v531_v13 = vpop.eup %530 }
 0x383   :  { %v373_v15 = vrot.slane %v531_v13, %v786_v30  ;;  %v377_v18 = vrot.slane %v531_v13, %v337_v60 }
 0x385   :  { %v380_v17 = vmul.f32 %v527_v4, %v373_v15  ;;  %v381_v19 = vmul.f32 %v529_v5, %v377_v18 }
 0x387   :  { %384 = vperm.xlu0 %521, %v380_v17  }
 0x38b   :  { %389 = vperm.xlu0 %521, %v381_v19  }
 0x406   :  { %v385_v20 = vpop.permute.xlu0 %384 }
 0x407   :  { %v392_v21 = vmul.f32 %v385_v20, %v764_v14  ;;  %v417_v25 = vrot.slane %v385_v20, %v317_v51 }
 0x409   :  { %v394_v22 = vsel %vm89_vm1, %v392_v21, 0.0 }
 0x40a   :  { %v395_v23 = vrot.slane %v394_v22, 4  ;;  %v390_v24 = vpop.permute.xlu0 %389 }
 0x40b   :  { %v393_v26 = vmul.f32 %v390_v24, %v771_v16  ;;  %v421_v27 = vrot.slane %v390_v24, %v317_v51 }
 0x40c   :  { %v396_v28 = vadd.f32 %v395_v23, %v394_v22 }
 0x40d   :  { %v401_v29 = vsel %vm89_vm1, %v393_v26, 0.0  ;;  %v422_v30 = vsel %vm323_vm2, %v421_v27, %v417_v25 }
 0x40e   :  { %v397_v31 = vrot.slane %v396_v28, 2  ;;  %v402_v32 = vrot.slane %v401_v29, 4  ;;  %424 = vst.msk [vmem:[#allocation10] sm:$0x3] %vm326_vm3, %v422_v30 }
 0x40f   :  { %609 = shalt.err (!%p606_p0)
}
 0x410   :  { %s610_s2 = scalar_lea.hbm %s846_s9, 32 }
 0x411   :  { %p611_p1 = scmp.ne.s32.totalorder %s846_s9, %s610_s2  ;;  %p614_p2 = scmp.lt.u32.totalorder %s610_s2, %s846_s9 }
 0x413   :  { %p616_p3 = pnand %p614_p2, %p611_p1 }
 0x415   :  { %619 = shalt.err (!%p616_p3)
}
 0x416   :  { %444 = dma.vmem_to_hbm [thread:$0]  %s442_s7, 32, %s846_s9, [#allocation11]   ;;  %v398_v14 = vadd.f32 %v397_v31, %v396_v28  ;;  %v403_v16 = vadd.f32 %v402_v32, %v401_v29  ;;  %vm412_vm4 = vcmask 254976  }
 0x417   :  { %s661_s19 = smov [#allocation9]  }
 0x418   :  { %v404_v33 = vrot.slane %v403_v16, 2  ;;  %v399_v34 = vrot.slane %v398_v14, 1  ;;  %s431_s20 = sshll.u32 %s661_s19, 4  ;;  %s432_s20 = int_to_ptr.vmem [resolvable:$true] %s431_s20 }
 0x419   :  { %s620_s23 = scalar_lea.vmem %s432_s20, 32  ;;  %p625_p5 = scmp.lt.s32.totalorder %s432_s20, %s432_s20 }
 0x41a   :  { %v405_v35 = vadd.f32 %v404_v33, %v403_v16  ;;  %v400_v38 = vadd.f32 %v399_v34, %v398_v14  ;;  %p621_p4 = scmp.ne.s32.totalorder %s432_s20, %s620_s23  ;;  %p626_p6 = scmp.lt.s32.totalorder %s620_s23, %s620_s23 }
 0x41c   :  { %v406_v36 = vrot.slane %v405_v35, 1  ;;  %p627_p7 = por %p626_p6, %p625_p5 }
 0x41e   :  { %v407_v37 = vadd.f32 %v406_v36, %v405_v35  ;;  %p628_p8 = pnand %p627_p7, %p621_p4 }
 0x420   :  { %v410_v39 = vsel %vm323_vm2, %v407_v37, %v400_v38 }
 0x421   :  { %413 = vst.msk [vmem:[#allocation9] sm:$0x3] %vm412_vm4, %v410_v39 }
 0x422   :  { %631 = shalt.err (!%p628_p8)
}
 0x423   :  { %s632_s25 = scalar_lea.hbm %s845_s8, 32 }
 0x424   :  { %p633_p9 = scmp.ne.s32.totalorder %s845_s8, %s632_s25  ;;  %p636_p10 = scmp.lt.u32.totalorder %s632_s25, %s845_s8 }
 0x426   :  { %p638_p11 = pnand %p636_p10, %p633_p9 }
 0x428   :  { %641 = shalt.err (!%p638_p11)
}
 0x429   :  { %434 = dma.vmem_to_hbm [thread:$0]  %s432_s20, 32, %s845_s8, [#allocation5]  }
 0x42a   :  { %646 = dma.done.wait [#allocation5], 32  }
 0x42b   :  { %647 = vsyncadd [#allocation5], 4294967264 }
 0x42c   :  { %648 = dma.done.wait [#allocation11], 32  }
 0x42d   :  { %649 = vsyncadd [#allocation11], 4294967264 }
 0x42e   :  { %451 = vsyncpa [#allocation4], 1 }
 0x42f   :  { %452 = vsyncpa [#allocation7], 1 }
 0x430   :  { %453 = vsyncpa [#allocation5], 1 }
 0x431   :  { %454 = vsyncpa [#allocation11], 1 }

</bundles_post_ra>
